<compile_context>
chip_gen: v7x
topology: tpu7x:2x2x1
jax: 0.10.0
libtpu: 0.0.40
codegen_flags: <defaults>
</compile_context>

<pallas_src>
import jax
import jax.numpy as jnp
from jax.experimental import pallas as pl
from jax.experimental.pallas import tpu as pltpu


# ----------------------------------------------------------------------------
# Pallas kernel: one batch-tile of the MLP forward (the HNN forward hot path)
# ----------------------------------------------------------------------------
def hnn_mlp_kernel(x_ref, w1_ref, b1_ref, w2_ref, b2_ref, w3_ref, o_ref):
    # hidden layer 1: (TB, D) @ (D, H) + (1, H) -> tanh   (f32 accumulation)
    h1 = jnp.tanh(
        jnp.dot(x_ref[...], w1_ref[...], preferred_element_type=jnp.float32)
        + b1_ref[...]
    )
    # hidden layer 2: (TB, H) @ (H, H) + (1, H) -> tanh
    h2 = jnp.tanh(
        jnp.dot(h1.astype(w2_ref.dtype), w2_ref[...],
                preferred_element_type=jnp.float32)
        + b2_ref[...]
    )
    # output layer (no bias); compact (TB, out_dim) store.
    o_ref[...] = jnp.dot(
        h2.astype(w3_ref.dtype), w3_ref[...],
        preferred_element_type=jnp.float32,
    ).astype(o_ref.dtype)


def _round_up(x, m):
    return ((x + m - 1) // m) * m


def hnn_forward(x, params, *, block_b=4096, use_bf16=False):
    """HNN.forward(x): the differentiable model's MLP as one gridded Pallas call.

    x:      (B, input_dim) float32
    params: (w1 (D,H), b1 (1,H), w2 (H,H), b2 (1,H), w3 (H,out))
    """
    w1, b1, w2, b2, w3 = params
    B, D = x.shape
    H = w1.shape[1]
    out_dim = w3.shape[1]

    if use_bf16:
        # bf16 DMA / MXU operands, f32 accumulation + f32 bias/tanh in-kernel.
        x = x.astype(jnp.bfloat16)
        w1 = w1.astype(jnp.bfloat16)
        w2 = w2.astype(jnp.bfloat16)
        w3 = w3.astype(jnp.bfloat16)

    # ---- batch tiling: sublane-aligned tile, ragged last block handled by
    # Pallas (no wrapper-side pad).  Force >=2 grid steps when possible so the
    # "parallel" batch axis can be sharded across both v7x TensorCores.
    n_tiles = max(2, pl.cdiv(B, block_b))
    TB = min(_round_up(pl.cdiv(B, n_tiles), 8), _round_up(B, 8))
    grid = (pl.cdiv(B, TB),)

    # Weights / biases: full-extent blocks, same block every grid step
    # (stay VMEM-resident across the whole grid).
    res = lambda a: pl.BlockSpec(a.shape, lambda i: (0, 0))

    # Advisory cost estimate (compact output, actual operand dtypes).
    itemsize = jnp.dtype(x.dtype).itemsize
    flops = 2 * B * (D * H + H * H + H * out_dim)
    transcendentals = 2 * B * H
    bytes_accessed = (
        itemsize * (B * D + D * H + H * H + H * out_dim)   # x + weights in
        + 4 * (2 * H)                                       # biases (f32)
        + 4 * (B * out_dim)                                 # y out (f32)
    )

    y = pl.pallas_call(
        hnn_mlp_kernel,
        out_shape=jax.ShapeDtypeStruct((B, out_dim), jnp.float32),
        grid=grid,
        in_specs=[
            pl.BlockSpec((TB, D), lambda i: (i, 0)),   # x tile streams
            res(w1), res(b1), res(w2), res(b2), res(w3),
        ],
        out_specs=pl.BlockSpec((TB, out_dim), lambda i: (i, 0)),
        compiler_params=pltpu.CompilerParams(
            dimension_semantics=("parallel",),         # shard batch tiles across TCs
        ),
        cost_estimate=pl.CostEstimate(
            flops=flops,
            transcendentals=transcendentals,
            bytes_accessed=bytes_accessed,
        ),
    )(x, w1, b1, w2, b2, w3)

    return y


# ----------------------------------------------------------------------------
# Parameter construction (deterministic, synthetic)
# ----------------------------------------------------------------------------
def init_params(key, input_dim, hidden_dim, output_dim):
    k1, k2, k3, k4, k5 = jax.random.split(key, 5)
    # Stored already transposed to (in, out) layout for x @ W.
    w1 = jax.random.normal(k1, (input_dim, hidden_dim), jnp.float32) * 0.1
    b1 = jax.random.normal(k2, (1, hidden_dim), jnp.float32) * 0.1
    w2 = jax.random.normal(k3, (hidden_dim, hidden_dim), jnp.float32) * 0.1
    b2 = jax.random.normal(k4, (1, hidden_dim), jnp.float32) * 0.1
    w3 = jax.random.normal(k5, (hidden_dim, output_dim), jnp.float32) * 0.1
    return (w1, b1, w2, b2, w3)


def permutation_tensor(n, assume_canonical_coords=True):
    """HNN.permutation_tensor (plain-JAX glue; built in __init__, unused in forward)."""
    if assume_canonical_coords:
        M = jnp.eye(n, dtype=jnp.float32)
        return jnp.concatenate([M[n // 2:], -M[: n // 2]], axis=0)
    # Levi-Civita-style construction
    M = jnp.ones((n, n), jnp.float32) * (1.0 - jnp.eye(n, dtype=jnp.float32))
    M = M.at[::2].multiply(-1.0)
    M = M.at[:, ::2].multiply(-1.0)
    iu = jnp.triu(jnp.ones((n, n), jnp.float32), k=1)
    return M * jnp.where(iu > 0, -1.0, 1.0)


# Pure-JAX reference for correctness check
def ref_forward(x, params):
    w1, b1, w2, b2, w3 = params
    h1 = jnp.tanh(x @ w1 + b1)
    h2 = jnp.tanh(h1 @ w2 + b2)
    return h2 @ w3


if __name__ == "__main__":
    # Small shapes consistent with the module: (q, p) coords -> input_dim even.
    batch, input_dim, hidden_dim, output_dim = 8, 4, 32, 2

    key = jax.random.PRNGKey(0)
    kx, kp = jax.random.split(key)
    x = jax.random.normal(kx, (batch, input_dim), jnp.float32)
    params = init_params(kp, input_dim, hidden_dim, output_dim)

    M = permutation_tensor(input_dim)  # built like HNN.__init__ (unused in forward)

    y = hnn_forward(x, params)
    y = jax.block_until_ready(y)

    y_ref = ref_forward(x, params)
    assert y.shape == (batch, output_dim)
    assert jnp.allclose(y, y_ref, atol=1e-5, rtol=1e-5), "mismatch vs reference"

    # Batch that is not a multiple of the tile size (ragged last block, grid>1).
    x_big = jax.random.normal(jax.random.PRNGKey(1), (77, input_dim), jnp.float32)
    y_big = jax.block_until_ready(hnn_forward(x_big, params, block_b=64))
    assert y_big.shape == (77, output_dim)
    assert jnp.allclose(y_big, ref_forward(x_big, params), atol=1e-5, rtol=1e-5)

    # bf16 operand path (v6e/v7x lever): loose tolerance vs the f32 reference.
    y_bf16 = jax.block_until_ready(
        hnn_forward(x_big, params, block_b=64, use_bf16=True))
    assert jnp.allclose(y_bf16, ref_forward(x_big, params), atol=5e-2, rtol=5e-2)

    print("KERNEL_OK")
</pallas_src>

<mosaic_0001>
module attributes {stable_mosaic.version = 11 : i64} {
  func.func @hnn_mlp_kernel(%arg0: i32, %arg1: memref<8x4xf32, #tpu.memory_space<vmem>>, %arg2: memref<4x32xf32, #tpu.memory_space<vmem>>, %arg3: memref<1x32xf32, #tpu.memory_space<vmem>>, %arg4: memref<32x32xf32, #tpu.memory_space<vmem>>, %arg5: memref<1x32xf32, #tpu.memory_space<vmem>>, %arg6: memref<32x2xf32, #tpu.memory_space<vmem>>, %arg7: memref<8x2xf32, #tpu.memory_space<vmem>>) attributes {dimension_semantics = [#tpu.dimension_semantics<parallel>], iteration_bounds = array<i64: 1>, scalar_prefetch = 0 : i64, scratch_operands = 0 : i64, tpu.core_type = #tpu.core_type<tc>, window_params = [{transform_indices = @transform_0, window_bounds = array<i64: 8, 4>}, {pipeline_mode = #tpu.pipeline_mode<synchronous>, transform_indices = @transform_1, window_bounds = array<i64: 4, 32>}, {pipeline_mode = #tpu.pipeline_mode<synchronous>, transform_indices = @transform_2, window_bounds = array<i64: 1, 32>}, {pipeline_mode = #tpu.pipeline_mode<synchronous>, transform_indices = @transform_3, window_bounds = array<i64: 32, 32>}, {pipeline_mode = #tpu.pipeline_mode<synchronous>, transform_indices = @transform_4, window_bounds = array<i64: 1, 32>}, {pipeline_mode = #tpu.pipeline_mode<synchronous>, transform_indices = @transform_5, window_bounds = array<i64: 32, 2>}, {transform_indices = @transform_6, window_bounds = array<i64: 8, 2>}]} {
    %c0 = arith.constant 0 : index
    %c0_0 = arith.constant 0 : index
    %0 = vector.load %arg1[%c0, %c0_0] : memref<8x4xf32, #tpu.memory_space<vmem>>, vector<8x4xf32>
    %c0_1 = arith.constant 0 : index
    %c0_2 = arith.constant 0 : index
    %1 = vector.load %arg2[%c0_1, %c0_2] : memref<4x32xf32, #tpu.memory_space<vmem>>, vector<4x32xf32>
    %cst = arith.constant dense<0.000000e+00> : vector<8x32xf32>
    %2 = tpu.matmul %0, %1, %cst {dimension_numbers = #tpu.dot_dimension_numbers<[1], [0], [0], [1], [0, 0, 1, 1], [], []>} : vector<8x4xf32>, vector<4x32xf32>, vector<8x32xf32> -> vector<8x32xf32>
    %c0_3 = arith.constant 0 : index
    %c0_4 = arith.constant 0 : index
    %3 = vector.load %arg3[%c0_3, %c0_4] : memref<1x32xf32, #tpu.memory_space<vmem>>, vector<1x32xf32>
    %4 = vector.broadcast %3 : vector<1x32xf32> to vector<8x32xf32>
    %5 = arith.addf %2, %4 : vector<8x32xf32>
    %6 = math.tanh %5 : vector<8x32xf32>
    %c0_5 = arith.constant 0 : index
    %c0_6 = arith.constant 0 : index
    %7 = vector.load %arg4[%c0_5, %c0_6] : memref<32x32xf32, #tpu.memory_space<vmem>>, vector<32x32xf32>
    %cst_7 = arith.constant dense<0.000000e+00> : vector<8x32xf32>
    %8 = tpu.matmul %6, %7, %cst_7 {dimension_numbers = #tpu.dot_dimension_numbers<[1], [0], [0], [1], [0, 0, 1, 1], [], []>} : vector<8x32xf32>, vector<32x32xf32>, vector<8x32xf32> -> vector<8x32xf32>
    %c0_8 = arith.constant 0 : index
    %c0_9 = arith.constant 0 : index
    %9 = vector.load %arg5[%c0_8, %c0_9] : memref<1x32xf32, #tpu.memory_space<vmem>>, vector<1x32xf32>
    %10 = vector.broadcast %9 : vector<1x32xf32> to vector<8x32xf32>
    %11 = arith.addf %8, %10 : vector<8x32xf32>
    %12 = math.tanh %11 : vector<8x32xf32>
    %c0_10 = arith.constant 0 : index
    %c0_11 = arith.constant 0 : index
    %13 = vector.load %arg6[%c0_10, %c0_11] : memref<32x2xf32, #tpu.memory_space<vmem>>, vector<32x2xf32>
    %cst_12 = arith.constant dense<0.000000e+00> : vector<8x2xf32>
    %14 = tpu.matmul %12, %13, %cst_12 {dimension_numbers = #tpu.dot_dimension_numbers<[1], [0], [0], [1], [0, 0, 1, 1], [], []>} : vector<8x32xf32>, vector<32x2xf32>, vector<8x2xf32> -> vector<8x2xf32>
    %c0_13 = arith.constant 0 : index
    %c0_14 = arith.constant 0 : index
    %15 = vector.load %arg7[%c0_13, %c0_14] : memref<8x2xf32, #tpu.memory_space<vmem>>, vector<8x2xf32>
    tpu.vector_store %arg7[%c0_13, %c0_14], %14 {strides = array<i32>} : memref<8x2xf32, #tpu.memory_space<vmem>>, vector<8x2xf32>,
    return
  }
  func.func @transform_0(%arg0: i32) -> (i32, i32) {
    %c0_i32 = arith.constant 0 : i32
    %c0_i32_0 = arith.constant 0 : i32
    return %arg0, %c0_i32 : i32, i32
  }
  func.func @transform_1(%arg0: i32) -> (i32, i32) {
    %c0_i32 = arith.constant 0 : i32
    %c0_i32_0 = arith.constant 0 : i32
    %c0_i32_1 = arith.constant 0 : i32
    return %c0_i32, %c0_i32_0 : i32, i32
  }
  func.func @transform_2(%arg0: i32) -> (i32, i32) {
    %c0_i32 = arith.constant 0 : i32
    %c0_i32_0 = arith.constant 0 : i32
    %c0_i32_1 = arith.constant 0 : i32
    return %c0_i32, %c0_i32_0 : i32, i32
  }
  func.func @transform_3(%arg0: i32) -> (i32, i32) {
    %c0_i32 = arith.constant 0 : i32
    %c0_i32_0 = arith.constant 0 : i32
    %c0_i32_1 = arith.constant 0 : i32
    return %c0_i32, %c0_i32_0 : i32, i32
  }
  func.func @transform_4(%arg0: i32) -> (i32, i32) {
    %c0_i32 = arith.constant 0 : i32
    %c0_i32_0 = arith.constant 0 : i32
    %c0_i32_1 = arith.constant 0 : i32
    return %c0_i32, %c0_i32_0 : i32, i32
  }
  func.func @transform_5(%arg0: i32) -> (i32, i32) {
    %c0_i32 = arith.constant 0 : i32
    %c0_i32_0 = arith.constant 0 : i32
    %c0_i32_1 = arith.constant 0 : i32
    return %c0_i32, %c0_i32_0 : i32, i32
  }
  func.func @transform_6(%arg0: i32) -> (i32, i32) {
    %c0_i32 = arith.constant 0 : i32
    %c0_i32_0 = arith.constant 0 : i32
    return %arg0, %c0_i32 : i32, i32
  }
}

</mosaic_0001>

<bundles_post_ra>
// kernel: tpu_custom_call.1
= control target key start
LH: loop header
LB: loop body
LE: loop exit
PB: predicated region body
PF: predicated region fallthrough
CT: control target
= control target key end

     0   :  { %vm36_vm0 = vcmask 1043456   ;;  %vm32_vm1 = vcmask 31744   ;;  %v344_v0 = vmov 0.0   ;;  %vm345_vm2 = vmmov 0   ;;  %s423_s1 = inlined_call_operand.vmem [shape: f32[4,32], index: 1, kind: input, shape index: {}]   ;;  %s424_s0 = inlined_call_operand.vmem [shape: f32[8,4], index: 0, kind: input, shape index: {}]   ;;  %s425_s3 = inlined_call_operand.vmem [shape: f32[32,32], index: 3, kind: input, shape index: {}]   ;;  %s426_s2 = inlined_call_operand.vmem [shape: f32[1,32], index: 2, kind: input, shape index: {}]   ;;  %s427_s5 = inlined_call_operand.vmem [shape: f32[32,2], index: 5, kind: input, shape index: {}]   ;;  %s428_s4 = inlined_call_operand.vmem [shape: f32[1,32], index: 4, kind: input, shape index: {}]   ;;  %s429_s6 = inlined_call_operand.vmem [shape: f32[8,2], index: 6, kind: output, shape index: {}]  }
   0x1   :  { %298 = vmatprep.subr.mxu0 %v344_v0  ;;  %v24_v1 = vld [vmem:[%s423_s1] sm:$0xf]  ;;  %300 = vmatprep.mubr.msk.f32.mxu0 %vm345_vm2, %v344_v0  ;;  %v346_v3 = vmov 0.0|0.0   ;;  %v112_v5 = vld [vmem:[%s425_s3 + $0x8] sm:$0xff]  ;;  %v113_v6 = vld [vmem:[%s425_s3 + $0x10] sm:$0xff]  ;;  %vm122_vm3 = vcmask 261120  }
   0x2   :  { %v23_v2 = vld [vmem:[%s424_s0] sm:$0xff]  ;;  %299 = vmatpush3.msk.msra.mxu0 %vm36_vm0, %v24_v1  ;;  %311 = vmatprep.mubr.msk.f32.mxu1 %vm345_vm2, %v344_v0  ;;  %v114_v8 = vld [vmem:[%s425_s3 + $0x18] sm:$0xff]  ;;  %v198_v16 = vld [vmem:[%s427_s5 + $0x8] sm:$0xff]  ;;  %vm274_vm4 = vcmask 15360  }
   0x3   :  { %301 = vmatmul.mubr.msk.f32.vlgmr.msra.gmra.mrb[0].mxu0 %vm32_vm1, %v23_v2  ;;  %325 = vmatprep.subr.bf16.mxu1 %v346_v3  ;;  %v111_v4 = vld [vmem:[%s425_s3] sm:$0xff]  ;;  %v329_v9 = vpack.c.bf16 %v114_v8, %v113_v6  ;;  %v199_v17 = vld [vmem:[%s427_s5 + $0x10] sm:$0xff]  ;;  %v200_v19 = vld [vmem:[%s427_s5 + $0x18] sm:$0xff] }
   0x4   :  { %322 = vmatprep.mubr.msk.f32.mxu0 %vm345_vm2, %v344_v0  ;;  %331 = vmatprep.subr.bf16.mxu0 %v346_v3  ;;  %v326_v7 = vpack.c.bf16 %v112_v5, %v111_v4  ;;  %v280_v10 = vld [vmem:[%s426_s2] ss:$0 sm:$0xff]  ;;  %v335_v20 = vpack.c.bf16 %v200_v19, %v199_v17 }
   0x5   :  { %v197_v15 = vld [vmem:[%s427_s5] sm:$0xff] }
   0x6   :  { %327 = vmatpush3.bf16.msra.mxu1 %v326_v7  ;;  %v332_v18 = vpack.c.bf16 %v198_v16, %v197_v15  ;;  %v283_v21 = vld [vmem:[%s428_s4] ss:$0 sm:$0xff] }
   0x7   :  { %328 = vmatprep.subr.bf16.mxu1 %v346_v3 }
   0x8   :  { %333 = vmatpush3.bf16.msra.mxu0 %v332_v18 }
   0x9   :  { %334 = vmatprep.subr.bf16.mxu0 %v346_v3 }
   0xa   :  { %330 = vmatpush3.bf16.msra.mxu1 %v329_v9 }
   0xc   :  { %336 = vmatpush3.bf16.msra.mxu0 %v335_v20 }
  0xd6   :  { %v106_v11 = vpop.f32.mrb[0].mxu0 }
  0xd7   :  { %v107_v12 = vadd.f32 %v280_v10, %v106_v11  ;;  %v302_v13 = vpop.f32.mrb[1].mxu0 }
  0xd9   :  { %340 = vtanh.f32 %v107_v12 }
  0xe3   :  { %v341_v14 = vpop.eup %340 }
  0xe4   :  { %312 = vmatmul.mubr.msk.f32.vlgmr.msra.gmra.mrb[0].mxu1 %vm122_vm3, %v341_v14 }
 0x1b7   :  { %v192_v22 = vpop.f32.mrb[0].mxu1 }
 0x1b8   :  { %v193_v23 = vadd.f32 %v283_v21, %v192_v22  ;;  %v313_v24 = vpop.f32.mrb[1].mxu1 }
 0x1ba   :  { %342 = vtanh.f32 %v193_v23 }
 0x1c4   :  { %v343_v25 = vpop.eup %342 }
 0x1c5   :  { %323 = vmatmul.mubr.msk.f32.vlgmr.msra.gmra.mrb[2].mxu0 %vm122_vm3, %v343_v25 }
 0x298   :  { %v270_v26 = vpop.f32.mrb[2].mxu0 }
 0x299   :  { %275 = vst.msk [vmem:[%s429_s6] sm:$0xff] %vm274_vm4, %v270_v26  ;;  %v324_v27 = vpop.f32.mrb[3].mxu0 }

</bundles_post_ra>
